<compile_context>
chip_gen: v5e
topology: v5e:2x2
jax: 0.10.0
libtpu: 0.0.40
codegen_flags: <defaults>
</compile_context>

<pallas_src>
import numpy as np
import jax
import jax.numpy as jnp
from jax import lax
from jax.experimental import pallas as pl
from jax.experimental.pallas import tpu as pltpu


def _pqmf_forward_kernel(xm_ref, hk_ref, halo_ref, o_ref, xpad_ref, xs_ref):
    """One (batch, time-tile) grid step.

    xm_ref:   (1, TT, M)    time-major polyphase tile (natural x layout)
    hk_ref:   (M, M*K)      flattened polyphase filter bank (== hk)
    halo_ref: (n_t, M, K)   band-major per-tile halos for this batch row
                            (cols [:K//2] = samples before the tile,
                             cols [K//2:] = samples after; zeros at edges)
    o_ref:    (1, M, TT)    sub-band output tile (after reverse_half)
    xpad_ref: (M, TT + K)   band-major padded-tile scratch (VMEM)
    xs_ref:   (M*K, TT)     im2col scratch (VMEM)
    """
    j = pl.program_id(1)
    M = o_ref.shape[1]
    TT = o_ref.shape[2]
    MK = hk_ref.shape[1]
    K = MK // M
    pad = K // 2

    # (TT, M) -> (M, TT) de-interleave on the MXU with exact 0/1 weights.
    # NT dot_general (contract the trailing dims of both operands) avoids both
    # the wrapper HBM transpose and a narrow-shape XLU transpose.
    eye = (lax.broadcasted_iota(jnp.int32, (M, M), 0)
           == lax.broadcasted_iota(jnp.int32, (M, M), 1)).astype(xm_ref.dtype)
    xm_bm = lax.dot_general(
        eye, xm_ref[0], (((1,), (1,)), ((), ())),
        preferred_element_type=jnp.float32).astype(xpad_ref.dtype)   # (M, TT)

    halo = halo_ref[j]                               # (M, K), VMEM-resident
    xpad_ref[:, :pad] = halo[:, :pad]
    xpad_ref[:, pad:pad + TT] = xm_bm
    xpad_ref[:, pad + TT:] = halo[:, pad:]

    # Seam-free im2col: xs[k*M + c, t] = xpad[c, t + k]; one contiguous
    # lane-dense slice copy per tap (static unroll).
    for k in range(K):
        xs_ref[k * M:(k + 1) * M, :] = xpad_ref[:, k:k + TT]

    # Single matmul with all taps folded into the contraction (depth M*K).
    acc = jnp.dot(hk_ref[...], xs_ref[...], preferred_element_type=jnp.float32)

    # reverse_half: negate odd bands at even (absolute) time indices.  Tiles
    # are 128-multiples whenever n_t > 1, so local parity == absolute parity.
    band_sign = jnp.where(
        (lax.broadcasted_iota(jnp.int32, (M, 1), 0) & 1) == 1, -1.0, 1.0)
    t_even = (lax.broadcasted_iota(jnp.int32, (1, TT), 1) & 1) == 0
    o_ref[0] = jnp.where(t_even, acc * band_sign, acc).astype(o_ref.dtype)


def _ceil_to(x, m):
    return -(-x // m) * m


def _vmem_bytes_per_step(tile_t, M, K, itemsize):
    """Rough per-grid-step VMEM footprint (double-buffered blocks + scratch),
    including (8, 128) sublane/lane padding of narrow dims."""
    x_blk = 2 * _ceil_to(tile_t, 8) * _ceil_to(M, 128) * itemsize     # time-major input block
    o_blk = 2 * _ceil_to(M, 8) * _ceil_to(tile_t, 128) * itemsize     # output block
    xs = _ceil_to(M * K, 8) * _ceil_to(tile_t, 128) * itemsize        # im2col scratch
    xpad = _ceil_to(M, 8) * _ceil_to(tile_t + K, 128) * itemsize
    w = _ceil_to(M, 8) * _ceil_to(M * K, 128) * itemsize
    return x_blk + o_blk + xs + xpad + w


def _choose_tile_t(Lt, M, K, B, itemsize, budget=20 << 20, target_steps=4):
    """Whole signal when short; otherwise the largest 128-multiple tile that
    fits the VMEM budget while leaving >= target_steps grid steps (keeps both
    v7x TensorCores fed) -- never the unbounded whole-signal fallback."""
    if Lt <= 1024 and _vmem_bytes_per_step(Lt, M, K, itemsize) <= budget:
        return Lt
    cands = [c for c in (8192, 4096, 2048, 1024, 512, 256, 128)
             if c >= K and _vmem_bytes_per_step(c, M, K, itemsize) <= budget]
    if not cands:
        return max(128, _ceil_to(K, 128))
    divisors = [c for c in cands if Lt % c == 0]
    pool = divisors if divisors else cands          # prefer no wrapper zero-pad pass
    for c in pool:                                  # largest first
        if B * (-(-Lt // c)) >= target_steps:
            return c
    return pool[-1]


def pqmf_forward(x, hk, *, tile_t=None):
    """PQMF polyphase analysis.  x: (B, L), hk: (M, T).

    Returns the sub-band signal of shape (B, M, L // M), matching
    PQMF.forward (polyphase=True, n_band=M): polyphase_forward + reverse_half.
    Works in x.dtype (f32 default; bf16 inputs also supported, f32 accumulate).
    """
    B, L = x.shape
    M, T = hk.shape
    if M == 1:
        return x[:, None, :]
    assert L % M == 0, "signal length must be divisible by n_band"
    assert T % M == 0, "filter length must be divisible by n_band"
    Lt = L // M
    K = T // M
    assert K % 2 == 0, "polyphase kernel length assumed even (T, M powers of 2)"
    pad = K // 2
    dtype = x.dtype
    itemsize = jnp.dtype(dtype).itemsize
    hk = hk.astype(dtype)

    # ---- time-tile planning (VMEM-bounded, enough grid steps for 2-TC chips) ----
    if tile_t is None:
        tile_t = _choose_tile_t(Lt, M, K, B, itemsize)
    if tile_t >= Lt:
        tile_t = Lt
    else:
        assert tile_t % 128 == 0, "interior tiles must be 128-multiples"
        assert tile_t >= K, "time tile must cover the polyphase kernel"
    n_t = -(-Lt // tile_t)
    Lt_pad = n_t * tile_t

    # ---- free time-major polyphase view (no wrapper HBM transpose of x) ----
    if Lt_pad != Lt:
        x = jnp.pad(x, ((0, 0), (0, (Lt_pad - Lt) * M)))
    x_tm = x.reshape(B, Lt_pad, M)

    # ---- per-tile halos from static slices of the free view (no gather) ----
    xv = x_tm.reshape(B, n_t, tile_t, M)
    zeros_edge = jnp.zeros((B, 1, pad, M), dtype)
    if n_t > 1:
        left = jnp.concatenate([zeros_edge, xv[:, :-1, tile_t - pad:, :]], axis=1)
        right = jnp.concatenate([xv[:, 1:, :pad, :], zeros_edge], axis=1)
    else:
        left, right = zeros_edge, zeros_edge
    halo = jnp.concatenate([left, right], axis=2)                 # (B, n_t, K, M)
    halo = jnp.swapaxes(halo, 2, 3).reshape(B * n_t, M, K)        # tiny, band-major

    est = _vmem_bytes_per_step(tile_t, M, K, itemsize)
    vmem_limit = int(min(64 << 20, max(2 * est, 32 << 20)))

    out = pl.pallas_call(
        _pqmf_forward_kernel,
        out_shape=jax.ShapeDtypeStruct((B, M, Lt_pad), dtype),
        grid_spec=pltpu.PrefetchScalarGridSpec(
            num_scalar_prefetch=0,
            grid=(B, n_t),
            in_specs=[
                pl.BlockSpec((1, tile_t, M), lambda b, j: (b, j, 0)),    # x (time-major)
                pl.BlockSpec((M, T), lambda b, j: (0, 0)),               # hk (resident)
                pl.BlockSpec((n_t, M, K), lambda b, j: (b, 0, 0)),       # halos (per-batch resident)
            ],
            out_specs=pl.BlockSpec((1, M, tile_t), lambda b, j: (b, 0, j)),
            scratch_shapes=[
                pltpu.VMEM((M, tile_t + K), dtype),
                pltpu.VMEM((M * K, tile_t), dtype),
            ],
        ),
        compiler_params=pltpu.CompilerParams(
            dimension_semantics=("parallel", "parallel"),
            vmem_limit_bytes=vmem_limit),
    )(x_tm, hk, halo)
    return out[:, :, :Lt] if Lt_pad != Lt else out


def _ref_forward(x, hk):
    """Pure-JAX reference of polyphase_forward + reverse_half (torch semantics)."""
    B, L = x.shape
    M, T = hk.shape
    Lt, K = L // M, T // M
    x_poly = x.reshape(B, Lt, M).transpose(0, 2, 1)
    w = hk.reshape(M, K, M).transpose(0, 2, 1)
    pad = K // 2
    y = lax.conv_general_dilated(
        x_poly, w, window_strides=(1,), padding=[(pad, pad)],
        dimension_numbers=("NCH", "OIH", "NCH"))
    y = y[..., :-1]                                               # [..., :-1] in torch code
    band = jnp.arange(M)[:, None]
    t = jnp.arange(y.shape[-1])[None, :]
    sign = jnp.where((band % 2 == 1) & (t % 2 == 0), -1.0, 1.0)
    return y * sign


if __name__ == "__main__":
    key = jax.random.PRNGKey(0)
    kx1, kh, kx2, kx3 = jax.random.split(key, 4)

    # TODO(synk): real PQMF builds hk host-side via scipy kaiserord/firwin/fmin filter
    # design (no Pallas equivalent); using a deterministic synthetic bank of the same
    # (M, T) shape with T the next power of 2.
    B, M, T = 2, 4, 64
    hk = 0.1 * jax.random.normal(kh, (M, T), dtype=jnp.float32)

    # Case 1: small single-tile path (L=64 -> Lt=16).
    L1 = 64
    x1 = jax.random.normal(kx1, (B, L1), dtype=jnp.float32)
    out1 = jax.block_until_ready(pqmf_forward(x1, hk))
    assert out1.shape == (B, M, L1 // M)
    np.testing.assert_allclose(np.asarray(out1), np.asarray(_ref_forward(x1, hk)),
                               rtol=2e-5, atol=2e-5)

    # Case 2: longer signal exercising the (batch, time-tile) grid + resident halos.
    L2 = 4096
    x2 = jax.random.normal(kx2, (B, L2), dtype=jnp.float32)
    out2 = jax.block_until_ready(pqmf_forward(x2, hk, tile_t=256))
    assert out2.shape == (B, M, L2 // M)
    np.testing.assert_allclose(np.asarray(out2), np.asarray(_ref_forward(x2, hk)),
                               rtol=2e-5, atol=2e-5)

    # Case 3: non-dividing length exercising the pad-to-tile + slice-back guardrail.
    L3 = 4 * 300
    x3 = jax.random.normal(kx3, (B, L3), dtype=jnp.float32)
    out3 = jax.block_until_ready(pqmf_forward(x3, hk, tile_t=128))
    assert out3.shape == (B, M, L3 // M)
    np.testing.assert_allclose(np.asarray(out3), np.asarray(_ref_forward(x3, hk)),
                               rtol=2e-5, atol=2e-5)

    print("KERNEL_OK")
</pallas_src>

<mosaic_0001>
module attributes {stable_mosaic.version = 11 : i64} {
  func.func @_pqmf_forward_kernel(%arg0: i32, %arg1: i32, %arg2: memref<1x16x4xf32, #tpu.memory_space<vmem>>, %arg3: memref<4x64xf32, #tpu.memory_space<vmem>>, %arg4: memref<1x4x16xf32, #tpu.memory_space<vmem>>, %arg5: memref<1x4x16xf32, #tpu.memory_space<vmem>>, %arg6: memref<4x32xf32, #tpu.memory_space<vmem>>, %arg7: memref<64x16xf32, #tpu.memory_space<vmem>>) attributes {dimension_semantics = [#tpu.dimension_semantics<parallel>, #tpu.dimension_semantics<parallel>], iteration_bounds = array<i64: 2, 1>, scalar_prefetch = 0 : i64, scratch_operands = 2 : i64, tpu.core_type = #tpu.core_type<tc>, window_params = [{transform_indices = @transform_0, window_bounds = array<i64: 1, 16, 4>}, {pipeline_mode = #tpu.pipeline_mode<synchronous>, transform_indices = @transform_1, window_bounds = array<i64: 4, 64>}, {transform_indices = @transform_2, window_bounds = array<i64: 1, 4, 16>}, {transform_indices = @transform_3, window_bounds = array<i64: 1, 4, 16>}]} {
    %0 = tpu.iota {dimensions = array<i32: 0>} : vector<4x4xi32>
    %1 = tpu.iota {dimensions = array<i32: 1>} : vector<4x4xi32>
    %2 = arith.cmpi eq, %0, %1 : vector<4x4xi32>
    %3 = arith.extui %2 : vector<4x4xi1> to vector<4x4xi32>
    %4 = arith.sitofp %3 : vector<4x4xi32> to vector<4x4xf32>
    %c0 = arith.constant 0 : index
    %c0_0 = arith.constant 0 : index
    %c0_1 = arith.constant 0 : index
    %5 = vector.load %arg2[%c0, %c0_0, %c0_1] : memref<1x16x4xf32, #tpu.memory_space<vmem>>, vector<1x16x4xf32>
    %6 = vector.shape_cast %5 : vector<1x16x4xf32> to vector<16x4xf32>
    %cst = arith.constant dense<0.000000e+00> : vector<4x16xf32>
    %7 = tpu.matmul %4, %6, %cst {dimension_numbers = #tpu.dot_dimension_numbers<[1], [1], [0], [0], [0, 0, 1, 0], [], []>} : vector<4x4xf32>, vector<16x4xf32>, vector<4x16xf32> -> vector<4x16xf32>
    %8 = arith.index_cast %arg1 : i32 to index
    %c0_2 = arith.constant 0 : index
    %c0_3 = arith.constant 0 : index
    %9 = vector.load %arg4[%8, %c0_2, %c0_3] : memref<1x4x16xf32, #tpu.memory_space<vmem>>, vector<1x4x16xf32>
    %10 = vector.shape_cast %9 : vector<1x4x16xf32> to vector<4x16xf32>
    %11 = vector.extract_strided_slice %10 {offsets = [0, 0], sizes = [4, 8], strides = [1, 1]} : vector<4x16xf32> to vector<4x8xf32>
    %c0_4 = arith.constant 0 : index
    %c0_5 = arith.constant 0 : index
    %12 = vector.load %arg6[%c0_4, %c0_5] : memref<4x32xf32, #tpu.memory_space<vmem>>, vector<4x8xf32>
    tpu.vector_store %arg6[%c0_4, %c0_5], %11 {strides = array<i32>} : memref<4x32xf32, #tpu.memory_space<vmem>>, vector<4x8xf32>,
    %c0_6 = arith.constant 0 : index
    %c8 = arith.constant 8 : index
    %13 = vector.load %arg6[%c0_6, %c8] : memref<4x32xf32, #tpu.memory_space<vmem>>, vector<4x16xf32>
    tpu.vector_store %arg6[%c0_6, %c8], %7 {strides = array<i32>} : memref<4x32xf32, #tpu.memory_space<vmem>>, vector<4x16xf32>,
    %14 = vector.extract_strided_slice %10 {offsets = [0, 8], sizes = [4, 8], strides = [1, 1]} : vector<4x16xf32> to vector<4x8xf32>
    %c0_7 = arith.constant 0 : index
    %c24 = arith.constant 24 : index
    %15 = vector.load %arg6[%c0_7, %c24] : memref<4x32xf32, #tpu.memory_space<vmem>>, vector<4x8xf32>
    tpu.vector_store %arg6[%c0_7, %c24], %14 {strides = array<i32>} : memref<4x32xf32, #tpu.memory_space<vmem>>, vector<4x8xf32>,
    %c0_8 = arith.constant 0 : index
    %c0_9 = arith.constant 0 : index
    %16 = vector.load %arg6[%c0_8, %c0_9] : memref<4x32xf32, #tpu.memory_space<vmem>>, vector<4x16xf32>
    %c0_10 = arith.constant 0 : index
    %c0_11 = arith.constant 0 : index
    %17 = vector.load %arg7[%c0_10, %c0_11] : memref<64x16xf32, #tpu.memory_space<vmem>>, vector<4x16xf32>
    tpu.vector_store %arg7[%c0_10, %c0_11], %16 {strides = array<i32>} : memref<64x16xf32, #tpu.memory_space<vmem>>, vector<4x16xf32>,
    %c0_12 = arith.constant 0 : index
    %c1 = arith.constant 1 : index
    %18 = vector.load %arg6[%c0_12, %c1] : memref<4x32xf32, #tpu.memory_space<vmem>>, vector<4x16xf32>
    %c4 = arith.constant 4 : index
    %c0_13 = arith.constant 0 : index
    %19 = vector.load %arg7[%c4, %c0_13] : memref<64x16xf32, #tpu.memory_space<vmem>>, vector<4x16xf32>
    tpu.vector_store %arg7[%c4, %c0_13], %18 {strides = array<i32>} : memref<64x16xf32, #tpu.memory_space<vmem>>, vector<4x16xf32>,
    %c0_14 = arith.constant 0 : index
    %c2 = arith.constant 2 : index
    %20 = vector.load %arg6[%c0_14, %c2] : memref<4x32xf32, #tpu.memory_space<vmem>>, vector<4x16xf32>
    %c8_15 = arith.constant 8 : index
    %c0_16 = arith.constant 0 : index
    %21 = vector.load %arg7[%c8_15, %c0_16] : memref<64x16xf32, #tpu.memory_space<vmem>>, vector<4x16xf32>
    tpu.vector_store %arg7[%c8_15, %c0_16], %20 {strides = array<i32>} : memref<64x16xf32, #tpu.memory_space<vmem>>, vector<4x16xf32>,
    %c0_17 = arith.constant 0 : index
    %c3 = arith.constant 3 : index
    %22 = vector.load %arg6[%c0_17, %c3] : memref<4x32xf32, #tpu.memory_space<vmem>>, vector<4x16xf32>
    %c12 = arith.constant 12 : index
    %c0_18 = arith.constant 0 : index
    %23 = vector.load %arg7[%c12, %c0_18] : memref<64x16xf32, #tpu.memory_space<vmem>>, vector<4x16xf32>
    tpu.vector_store %arg7[%c12, %c0_18], %22 {strides = array<i32>} : memref<64x16xf32, #tpu.memory_space<vmem>>, vector<4x16xf32>,
    %c0_19 = arith.constant 0 : index
    %c4_20 = arith.constant 4 : index
    %24 = vector.load %arg6[%c0_19, %c4_20] : memref<4x32xf32, #tpu.memory_space<vmem>>, vector<4x16xf32>
    %c16 = arith.constant 16 : index
    %c0_21 = arith.constant 0 : index
    %25 = vector.load %arg7[%c16, %c0_21] : memref<64x16xf32, #tpu.memory_space<vmem>>, vector<4x16xf32>
    tpu.vector_store %arg7[%c16, %c0_21], %24 {strides = array<i32>} : memref<64x16xf32, #tpu.memory_space<vmem>>, vector<4x16xf32>,
    %c0_22 = arith.constant 0 : index
    %c5 = arith.constant 5 : index
    %26 = vector.load %arg6[%c0_22, %c5] : memref<4x32xf32, #tpu.memory_space<vmem>>, vector<4x16xf32>
    %c20 = arith.constant 20 : index
    %c0_23 = arith.constant 0 : index
    %27 = vector.load %arg7[%c20, %c0_23] : memref<64x16xf32, #tpu.memory_space<vmem>>, vector<4x16xf32>
    tpu.vector_store %arg7[%c20, %c0_23], %26 {strides = array<i32>} : memref<64x16xf32, #tpu.memory_space<vmem>>, vector<4x16xf32>,
    %c0_24 = arith.constant 0 : index
    %c6 = arith.constant 6 : index
    %28 = vector.load %arg6[%c0_24, %c6] : memref<4x32xf32, #tpu.memory_space<vmem>>, vector<4x16xf32>
    %c24_25 = arith.constant 24 : index
    %c0_26 = arith.constant 0 : index
    %29 = vector.load %arg7[%c24_25, %c0_26] : memref<64x16xf32, #tpu.memory_space<vmem>>, vector<4x16xf32>
    tpu.vector_store %arg7[%c24_25, %c0_26], %28 {strides = array<i32>} : memref<64x16xf32, #tpu.memory_space<vmem>>, vector<4x16xf32>,
    %c0_27 = arith.constant 0 : index
    %c7 = arith.constant 7 : index
    %30 = vector.load %arg6[%c0_27, %c7] : memref<4x32xf32, #tpu.memory_space<vmem>>, vector<4x16xf32>
    %c28 = arith.constant 28 : index
    %c0_28 = arith.constant 0 : index
    %31 = vector.load %arg7[%c28, %c0_28] : memref<64x16xf32, #tpu.memory_space<vmem>>, vector<4x16xf32>
    tpu.vector_store %arg7[%c28, %c0_28], %30 {strides = array<i32>} : memref<64x16xf32, #tpu.memory_space<vmem>>, vector<4x16xf32>,
    %c0_29 = arith.constant 0 : index
    %c8_30 = arith.constant 8 : index
    %32 = vector.load %arg6[%c0_29, %c8_30] : memref<4x32xf32, #tpu.memory_space<vmem>>, vector<4x16xf32>
    %c32 = arith.constant 32 : index
    %c0_31 = arith.constant 0 : index
    %33 = vector.load %arg7[%c32, %c0_31] : memref<64x16xf32, #tpu.memory_space<vmem>>, vector<4x16xf32>
    tpu.vector_store %arg7[%c32, %c0_31], %32 {strides = array<i32>} : memref<64x16xf32, #tpu.memory_space<vmem>>, vector<4x16xf32>,
    %c0_32 = arith.constant 0 : index
    %c9 = arith.constant 9 : index
    %34 = vector.load %arg6[%c0_32, %c9] : memref<4x32xf32, #tpu.memory_space<vmem>>, vector<4x16xf32>
    %c36 = arith.constant 36 : index
    %c0_33 = arith.constant 0 : index
    %35 = vector.load %arg7[%c36, %c0_33] : memref<64x16xf32, #tpu.memory_space<vmem>>, vector<4x16xf32>
    tpu.vector_store %arg7[%c36, %c0_33], %34 {strides = array<i32>} : memref<64x16xf32, #tpu.memory_space<vmem>>, vector<4x16xf32>,
    %c0_34 = arith.constant 0 : index
    %c10 = arith.constant 10 : index
    %36 = vector.load %arg6[%c0_34, %c10] : memref<4x32xf32, #tpu.memory_space<vmem>>, vector<4x16xf32>
    %c40 = arith.constant 40 : index
    %c0_35 = arith.constant 0 : index
    %37 = vector.load %arg7[%c40, %c0_35] : memref<64x16xf32, #tpu.memory_space<vmem>>, vector<4x16xf32>
    tpu.vector_store %arg7[%c40, %c0_35], %36 {strides = array<i32>} : memref<64x16xf32, #tpu.memory_space<vmem>>, vector<4x16xf32>,
    %c0_36 = arith.constant 0 : index
    %c11 = arith.constant 11 : index
    %38 = vector.load %arg6[%c0_36, %c11] : memref<4x32xf32, #tpu.memory_space<vmem>>, vector<4x16xf32>
    %c44 = arith.constant 44 : index
    %c0_37 = arith.constant 0 : index
    %39 = vector.load %arg7[%c44, %c0_37] : memref<64x16xf32, #tpu.memory_space<vmem>>, vector<4x16xf32>
    tpu.vector_store %arg7[%c44, %c0_37], %38 {strides = array<i32>} : memref<64x16xf32, #tpu.memory_space<vmem>>, vector<4x16xf32>,
    %c0_38 = arith.constant 0 : index
    %c12_39 = arith.constant 12 : index
    %40 = vector.load %arg6[%c0_38, %c12_39] : memref<4x32xf32, #tpu.memory_space<vmem>>, vector<4x16xf32>
    %c48 = arith.constant 48 : index
    %c0_40 = arith.constant 0 : index
    %41 = vector.load %arg7[%c48, %c0_40] : memref<64x16xf32, #tpu.memory_space<vmem>>, vector<4x16xf32>
    tpu.vector_store %arg7[%c48, %c0_40], %40 {strides = array<i32>} : memref<64x16xf32, #tpu.memory_space<vmem>>, vector<4x16xf32>,
    %c0_41 = arith.constant 0 : index
    %c13 = arith.constant 13 : index
    %42 = vector.load %arg6[%c0_41, %c13] : memref<4x32xf32, #tpu.memory_space<vmem>>, vector<4x16xf32>
    %c52 = arith.constant 52 : index
    %c0_42 = arith.constant 0 : index
    %43 = vector.load %arg7[%c52, %c0_42] : memref<64x16xf32, #tpu.memory_space<vmem>>, vector<4x16xf32>
    tpu.vector_store %arg7[%c52, %c0_42], %42 {strides = array<i32>} : memref<64x16xf32, #tpu.memory_space<vmem>>, vector<4x16xf32>,
    %c0_43 = arith.constant 0 : index
    %c14 = arith.constant 14 : index
    %44 = vector.load %arg6[%c0_43, %c14] : memref<4x32xf32, #tpu.memory_space<vmem>>, vector<4x16xf32>
    %c56 = arith.constant 56 : index
    %c0_44 = arith.constant 0 : index
    %45 = vector.load %arg7[%c56, %c0_44] : memref<64x16xf32, #tpu.memory_space<vmem>>, vector<4x16xf32>
    tpu.vector_store %arg7[%c56, %c0_44], %44 {strides = array<i32>} : memref<64x16xf32, #tpu.memory_space<vmem>>, vector<4x16xf32>,
    %c0_45 = arith.constant 0 : index
    %c15 = arith.constant 15 : index
    %46 = vector.load %arg6[%c0_45, %c15] : memref<4x32xf32, #tpu.memory_space<vmem>>, vector<4x16xf32>
    %c60 = arith.constant 60 : index
    %c0_46 = arith.constant 0 : index
    %47 = vector.load %arg7[%c60, %c0_46] : memref<64x16xf32, #tpu.memory_space<vmem>>, vector<4x16xf32>
    tpu.vector_store %arg7[%c60, %c0_46], %46 {strides = array<i32>} : memref<64x16xf32, #tpu.memory_space<vmem>>, vector<4x16xf32>,
    %c0_47 = arith.constant 0 : index
    %c0_48 = arith.constant 0 : index
    %48 = vector.load %arg3[%c0_47, %c0_48] : memref<4x64xf32, #tpu.memory_space<vmem>>, vector<4x64xf32>
    %c0_49 = arith.constant 0 : index
    %c0_50 = arith.constant 0 : index
    %49 = vector.load %arg7[%c0_49, %c0_50] : memref<64x16xf32, #tpu.memory_space<vmem>>, vector<64x16xf32>
    %cst_51 = arith.constant dense<0.000000e+00> : vector<4x16xf32>
    %50 = tpu.matmul %48, %49, %cst_51 {dimension_numbers = #tpu.dot_dimension_numbers<[1], [0], [0], [1], [0, 0, 1, 1], [], []>} : vector<4x64xf32>, vector<64x16xf32>, vector<4x16xf32> -> vector<4x16xf32>
    %51 = tpu.iota {dimensions = array<i32: 0>} : vector<4x1xi32>
    %c1_i32 = arith.constant 1 : i32
    %52 = vector.broadcast %c1_i32 : i32 to vector<4x1xi32>
    %53 = arith.andi %51, %52 : vector<4x1xi32>
    %c1_i32_52 = arith.constant 1 : i32
    %54 = vector.broadcast %c1_i32_52 : i32 to vector<4x1xi32>
    %55 = arith.cmpi eq, %53, %54 : vector<4x1xi32>
    %cst_53 = arith.constant -1.000000e+00 : f32
    %cst_54 = arith.constant 1.000000e+00 : f32
    %56 = vector.broadcast %cst_53 : f32 to vector<4x1xf32>
    %57 = vector.broadcast %cst_54 : f32 to vector<4x1xf32>
    %58 = arith.select %55, %56, %57 : vector<4x1xi1>, vector<4x1xf32>
    %59 = tpu.iota {dimensions = array<i32: 1>} : vector<1x16xi32>
    %c1_i32_55 = arith.constant 1 : i32
    %60 = vector.broadcast %c1_i32_55 : i32 to vector<1x16xi32>
    %61 = arith.andi %59, %60 : vector<1x16xi32>
    %c0_i32 = arith.constant 0 : i32
    %62 = vector.broadcast %c0_i32 : i32 to vector<1x16xi32>
    %63 = arith.cmpi eq, %61, %62 : vector<1x16xi32>
    %64 = vector.broadcast %58 : vector<4x1xf32> to vector<4x16xf32>
    %65 = arith.mulf %50, %64 : vector<4x16xf32>
    %66 = vector.shape_cast %63 : vector<1x16xi1> to vector<1x16xi1>
    %67 = vector.broadcast %66 : vector<1x16xi1> to vector<4x16xi1>
    %68 = arith.select %67, %65, %50 : vector<4x16xi1>, vector<4x16xf32>
    %c0_56 = arith.constant 0 : index
    %c0_57 = arith.constant 0 : index
    %c0_58 = arith.constant 0 : index
    %69 = vector.load %arg5[%c0_56, %c0_57, %c0_58] : memref<1x4x16xf32, #tpu.memory_space<vmem>>, vector<1x4x16xf32>
    %70 = vector.shape_cast %69 : vector<1x4x16xf32> to vector<4x16xf32>
    %71 = vector.shape_cast %68 : vector<4x16xf32> to vector<1x4x16xf32>
    tpu.vector_store %arg5[%c0_56, %c0_57, %c0_58], %71 {strides = array<i32>} : memref<1x4x16xf32, #tpu.memory_space<vmem>>, vector<1x4x16xf32>,
    return
  }
  func.func @transform_0(%arg0: i32, %arg1: i32) -> (i32, i32, i32) {
    %c0_i32 = arith.constant 0 : i32
    %c0_i32_0 = arith.constant 0 : i32
    return %arg0, %arg1, %c0_i32 : i32, i32, i32
  }
  func.func @transform_1(%arg0: i32, %arg1: i32) -> (i32, i32) {
    %c0_i32 = arith.constant 0 : i32
    %c0_i32_0 = arith.constant 0 : i32
    %c0_i32_1 = arith.constant 0 : i32
    return %c0_i32, %c0_i32_0 : i32, i32
  }
  func.func @transform_2(%arg0: i32, %arg1: i32) -> (i32, i32, i32) {
    %c0_i32 = arith.constant 0 : i32
    %c0_i32_0 = arith.constant 0 : i32
    %c0_i32_1 = arith.constant 0 : i32
    return %arg0, %c0_i32, %c0_i32_0 : i32, i32, i32
  }
  func.func @transform_3(%arg0: i32, %arg1: i32) -> (i32, i32, i32) {
    %c0_i32 = arith.constant 0 : i32
    %c0_i32_0 = arith.constant 0 : i32
    return %arg0, %c0_i32, %arg1 : i32, i32, i32
  }
}

</mosaic_0001>

<bundles_post_ra>
// kernel: tpu_custom_call.1
= control target key start
LH: loop header
LB: loop body
LE: loop exit
PB: predicated region body
PF: predicated region fallthrough
CT: control target
= control target key end

     0   :  { %8 = vsyncpa [#allocation5], 0  ;;  %s853_s0 = inlined_call_operand.vmem [shape: f32[2,16,4], index: 0, kind: input, shape index: {}]   ;;  %s854_s1 = inlined_call_operand.vmem [shape: f32[4,64], index: 1, kind: input, shape index: {}]   ;;  %s855_s2 = inlined_call_operand.vmem [shape: f32[2,4,16], index: 2, kind: input, shape index: {}]   ;;  %s856_s3 = inlined_call_operand.hbm [shape: f32[2,4,16], index: 3, kind: output, shape index: {}]  }
   0x1   :  { %10 = vsyncpa [#allocation5 + $0x1], 0  ;;  %s725_s12 = smov 0   ;;  %s727_s13 = smov 0  }
   0x2   :  { %s729_s14 = smov 0   ;;  %s731_s15 = smov 0  }
   0x3   :  { %s733_s16 = smov 0   ;;  %s735_s17 = smov 0  }
   0x4 LB: > { %s513_s18 = sadd.s32 4294967295, %s684_s17   ;;  %s514_s19 = sadd.s32 4294967294, %s684_s17   ;;  %s684_s17 = sphi %s735_s17, %s16_s17   ;;  %s680_s16 = sphi %s733_s16, %s863_s16   ;;  %s676_s15 = sphi %s731_s15, %s862_s15   ;;  %s672_s14 = sphi %s729_s14, %s861_s14   ;;  %s668_s13 = sphi %s727_s13, %s860_s13   ;;  %s664_s12 = sphi %s725_s12, %s859_s12  }
   0x5   : > { %s28_s20 = sadd.s32 1, %s680_s16  ;;  %s112_s21 = sadd.s32 1, %s672_s14 }
   0x6   : > { %p30_p0 = scmp.ge.s32.totalorder %s28_s20, 2  ;;  %p122_p1 = scmp.ne.s32.totalorder %s672_s14, %s668_s13 }
   0x7   : > { %p123_p2 = scmp.eq.s32.totalorder %s513_s18, 1  ;;  %p128_p3 = scmp.ne.s32.totalorder %s668_s13, %s664_s12 }
   0x8   : > { %s865_s20 = smov (%p30_p0, %s28_s20), 0  ;;  %p129_p5 = scmp.eq.s32.totalorder %s514_s19, 1 }
   0x9   : > { %p765_p4 = por %p123_p2, %p122_p1  ;;  %s107_s23 = ssub.s32 %s680_s16, %s865_s20 }
   0xa   : > { %p517_p6 = scmp.ge.s32.totalorder %s684_s17, 1  ;;  %p110_p7 = scmp.eq.s32.totalorder %s107_s23, 0 }
   0xb   : > { %p772_p8 = por %p129_p5, %p128_p3  ;;  %p170_p9 = scmp.lt.s32.totalorder %s684_s17, 3 }
   0xc   : > { %s778_s25 = scalar_select %p110_p7, %s672_s14, %s112_s21  }
   0xd   : > { %p171_p10 = pnand %p517_p6, %p170_p9 }
   0xe   : > { %p203_p11 = scmp.lt.s32.totalorder (!%p171_p10), %s676_s15, 1  ;;  %s687_s8 = smov (!%p171_p10), 8  }
   0xf   : > { %174 = sbr.rel (%p171_p10) target bundleno = 585 (0x249), region = 32  ;;  %s688_s9 = smov (!%p171_p10), 16  }
  0x10   : > { %s689_s10 = smov (!%p171_p10), 114   ;;  %s690_s11 = smov (!%p171_p10), 116  }
  0x11   : > { %s691_s18 = smov (!%p171_p10), 118   ;;  %s692_s19 = smov (!%p171_p10), 113  }
  0x12   : > { %s693_s21 = smov (!%p171_p10), 115   ;;  %s694_s23 = smov (!%p171_p10), 119  }
  0x13   : > { %s697_s28 = smov (!%p171_p10), 124   ;;  %s698_s29 = smov (!%p171_p10), 121  }
  0x14   : > { %v216_v0 = vlaneseq  ;;  %s204_s26 = scalar_select %p203_p11, %s676_s15, 1  ;;  %vm225_vm0 = vcmask 31744   ;;  %v686_v5 = vmov 0.0   ;;  %vm258_vm2 = vcmask 60416   ;;  %v365_v49 = vld [vmem:[%s854_s1] sm:$0xf] }
  0x15   : > { %vm264_vm3 = vcmask 191552   ;;  %vm270_vm4 = vcmask 257216   ;;  %vm273_vm5 = vcmask 125952   ;;  %s701_s5 = smov 123   ;;  %s702_s6 = smov 126   ;;  %vm374_vm6 = vcmask 523264  }
  0x16   : > { %s531_s27 = sshll.u32 %s204_s26, 4  ;;  %v782_v1 = vshrl.u32 %v216_v0, 7  ;;  %v784_v2 = vand.u32 127, %v216_v0  ;;  %s521_s4 = sshll.u32 %s204_s26, 2  ;;  %v704_v53 = vmov 1.0  }
  0x17   : > { %s210_s30 = scalar_lea.vmem %s853_s0, %s531_s27  ;;  %s215_s7 = scalar_lea.vmem %s855_s2, %s521_s4 }
  0x18   : > { %v224_v3 = vld [vmem:[%s210_s30 + $0x8] sm:$0xff]  ;;  %v223_v4 = vld [vmem:[%s210_s30] sm:$0xff]  ;;  %vm220_vm1 = vcmp.eq.s32.totalorder %v782_v1, %v784_v2  ;;  %s695_s26 = smov 117   ;;  %s696_s27 = smov 120   ;;  %v398_v51 = vand.u32 1, %v782_v1  ;;  %v401_v52 = vand.u32 1, %v784_v2 }
  0x19   : > { %523 = vmatpush.xpose.msk.msra.mxu0 %vm225_vm0, %v224_v3  ;;  %v522_v6 = vsel %vm220_vm1, 1.0, %v686_v5  ;;  %v257_v7 = vld [vmem:[%s215_s7] sm:$0xf]  ;;  %s699_s30 = smov 122   ;;  %s700_s4 = smov 125  }
  0x1a   : > { %259 = vst.msk [vmem:[#allocation2] sm:$0xf] %vm258_vm2, %v257_v7  ;;  %s703_s7 = smov 127   ;;  %vm399_vm7 = vcmp.eq.s32.totalorder %v398_v51, 1  ;;  %vm402_vm8 = vcmp.eq.s32.totalorder %v401_v52, 0 }
  0x1b   : > { %v400_v54 = vsel %vm399_vm7, -1.0, %v704_v53 }
  0x1d   : > { %524 = vmatpush.xpose.msk.msra.mxu0 %vm225_vm0, %v223_v4 }
  0x20   : > { %525 = vmatmul.msk.f32.vlgmr.msra.gmra.mxu0 %vm225_vm0, %v522_v6 }
  0x9d   : > { %v252_v8 = vpop.f32.mrf.mxu0 }
  0x9e   : > { %261 = vrot.lane.b32.xlu0 %v252_v8, %s687_s8 }
  0xa6   : > { %267 = vrot.lane.b32.xlu0 %v257_v7, %s688_s9 }
 0x110   : > { %v262_v9 = vpop.permute.xlu0 %261 }
 0x111   : > { %265 = vst.msk [vmem:[#allocation2] sm:$0xf] %vm264_vm3, %v262_v9 }
 0x118   : > { %v268_v10 = vpop.permute.xlu0 %267 }
 0x119   : > { %271 = vst.msk [vmem:[#allocation2] sm:$0xf] %vm270_vm4, %v268_v10 }
 0x120   : > { %v353_v11 = vld [vmem:[#allocation2] sm:$0xf] }
 0x121   : > { %v341_v12 = vld [vmem:[#allocation2] sm:$0xf]  ;;  %355 = vrot.lane.b32.xlu1 %v353_v11, %s689_s10  ;;  %s199_s10 = sand.u32 1, %s668_s13  }
 0x122   : > { %v329_v13 = vld [vmem:[#allocation2] sm:$0xf]  ;;  %343 = vrot.lane.b32.xlu2 %v341_v12, %s690_s11  ;;  %s518_s11 = sshll.u32 %s199_s10, 2 }
 0x123   : > { %331 = vrot.lane.b32.xlu0 %v329_v13, %s691_s18  ;;  %v272_v14 = vld [vmem:[#allocation2] sm:$0xf]  ;;  %s528_s18 = sshll.u32 %s676_s15, 2  ;;  %s409_s15 = scalar_lea.sflag [#allocation5], %s199_s10 }
 0x124   : > { %274 = vst.msk [vmem:[#allocation3] sm:$0xf] %vm273_vm5, %v272_v14  ;;  %v359_v15 = vld [vmem:[#allocation2] sm:$0xf] }
 0x125   : > { %v347_v16 = vld [vmem:[#allocation2] sm:$0xf] }
 0x126   : > { %v323_v17 = vld [vmem:[#allocation2] sm:$0xf] }
 0x127   : > { %v335_v18 = vld [vmem:[#allocation2] sm:$0xf] }
 0x128   : > { %v317_v19 = vld [vmem:[#allocation2] sm:$0xf] }
 0x129   : > { %361 = vrot.lane.b32.xlu1 %v359_v15, %s692_s19  ;;  %v293_v20 = vld [vmem:[#allocation2] sm:$0xf] }
 0x12a   : > { %349 = vrot.lane.b32.xlu2 %v347_v16, %s693_s21  ;;  %v311_v21 = vld [vmem:[#allocation2] sm:$0xf] }
 0x12b   : > { %325 = vrot.lane.b32.xlu0 %v323_v17, %s694_s23  ;;  %v305_v22 = vld [vmem:[#allocation2] sm:$0xf]  ;;  %s420_s23 = scalar_lea.hbm %s856_s3, %s528_s18 }
 0x12c   : > { %v287_v23 = vld [vmem:[#allocation2] sm:$0xf] }
 0x12d   : > { %v299_v24 = vld [vmem:[#allocation2] sm:$0xf] }
 0x12e   : > { %v281_v25 = vld [vmem:[#allocation2] sm:$0xf] }
 0x12f   : > { %v275_v26 = vld [vmem:[#allocation2] sm:$0xf] }
 0x131   : > { %337 = vrot.lane.b32.xlu1 %v335_v18, %s695_s26  ;;  %s201_s26 = scalar_lea.vmem [#allocation4], %s518_s11 }
 0x132   : > { %319 = vrot.lane.b32.xlu2 %v317_v19, %s696_s27  ;;  %s422_s27 = sshll.u32 %s201_s26, 4  ;;  %s423_s27 = int_to_ptr.vmem [resolvable:$true] %s422_s27 }
 0x133   : > { %295 = vrot.lane.b32.xlu0 %v293_v20, %s697_s28  ;;  %s424_s28 = sshll.u32 %s420_s23, 4  ;;  %s425_s28 = int_to_ptr.hbm [resolvable:$true] %s424_s28 }
 0x139   : > { %307 = vrot.lane.b32.xlu1 %v305_v22, %s699_s30 }
 0x13a   : > { %313 = vrot.lane.b32.xlu2 %v311_v21, %s698_s29  ;;  %s620_s29 = sshra.s32 %s425_s28, 4  ;;  %s621_s29 = int_to_ptr.hbm [resolvable:$true] %s620_s29 }
 0x13b   : > { %289 = vrot.lane.b32.xlu0 %v287_v23, %s700_s4  ;;  %s622_s30 = scalar_lea.hbm %s621_s29, 4  ;;  %p627_p1 = scmp.lt.s32.totalorder %s621_s29, %s856_s3 }
 0x13c   : > { %p623_p12 = scmp.ne.s32.totalorder %s621_s29, %s622_s30 }
 0x13e   : > { %p624_p13 = pnand %p623_p12, %p765_p4 }
 0x140   : > { %p625_p0 = pneg %p624_p13 }
 0x141   : > { %301 = vrot.lane.b32.xlu1 %v299_v24, %s701_s5 }
 0x142   : > { %283 = vrot.lane.b32.xlu2 %v281_v25, %s702_s6  ;;  %s626_s6 = scalar_lea.hbm %s856_s3, 8 }
 0x143   : > { %p628_p2 = scmp.lt.s32.totalorder %s626_s6, %s622_s30 }
 0x145   : > { %p629_p3 = por %p628_p2, %p627_p1 }
 0x147   : > { %p630_p5 = pnand %p629_p3, %p625_p0 }
 0x149   : > { %277 = vrot.lane.b32.xlu1 %v275_v26, %s703_s7 }
 0x17c   : > { %v344_v27 = vpop.permute.xlu2 %343 }
 0x17d   : > { %346 = vst.msk [vmem:[#allocation3 + $0x30] sm:$0xf] %vm273_vm5, %v344_v27 }
 0x184   : > { %v350_v28 = vpop.permute.xlu2 %349 }
 0x185   : > { %352 = vst.msk [vmem:[#allocation3 + $0x34] sm:$0xf] %vm273_vm5, %v350_v28 }
 0x18c   : > { %v320_v29 = vpop.permute.xlu2 %319  ;;  %v372_v39 = vld [vmem:[#allocation3 + $0x30] sm:$0xff] }
 0x18d   : > { %322 = vst.msk [vmem:[#allocation3 + $0x20] sm:$0xf] %vm273_vm5, %v320_v29 }
 0x193   : > { %v356_v30 = vpop.permute.xlu1 %355 }
 0x194   : > { %v314_v31 = vpop.permute.xlu2 %313  ;;  %358 = vst.msk [vmem:[#allocation3 + $0x38] sm:$0xf] %vm273_vm5, %v356_v30 }
 0x195   : > { %v332_v32 = vpop.permute.xlu0 %331  ;;  %316 = vst.msk [vmem:[#allocation3 + $0x1c] sm:$0xf] %vm273_vm5, %v314_v31 }
 0x196   : > { %334 = vst.msk [vmem:[#allocation3 + $0x28] sm:$0xf] %vm273_vm5, %v332_v32 }
 0x19b   : > { %v362_v33 = vpop.permute.xlu1 %361 }
 0x19c   : > { %v284_v34 = vpop.permute.xlu2 %283  ;;  %364 = vst.msk [vmem:[#allocation3 + $0x3c] sm:$0xf] %vm273_vm5, %v362_v33 }
 0x19d   : > { %v326_v35 = vpop.permute.xlu0 %325  ;;  %286 = vst.msk [vmem:[#allocation3 + $0x8] sm:$0xf] %vm273_vm5, %v284_v34 }
 0x19e   : > { %328 = vst.msk [vmem:[#allocation3 + $0x24] sm:$0xf] %vm273_vm5, %v326_v35 }
 0x1a3   : > { %v338_v36 = vpop.permute.xlu1 %337  ;;  %v373_v37 = vld [vmem:[#allocation3 + $0x38] sm:$0xff] }
 0x1a4   : > { %340 = vst.msk [vmem:[#allocation3 + $0x2c] sm:$0xf] %vm273_vm5, %v338_v36  ;;  %386 = vmatpush.msra.mxu1 %v373_v37 }
 0x1a5   : > { %v296_v38 = vpop.permute.xlu0 %295  ;;  %v370_v43 = vld [vmem:[#allocation3 + $0x20] sm:$0xff] }
 0x1a6   : > { %298 = vst.msk [vmem:[#allocation3 + $0x10] sm:$0xf] %vm273_vm5, %v296_v38  ;;  %387 = vmatpush.msra.mxu1 %v372_v39 }
 0x1ab   : > { %v308_v40 = vpop.permute.xlu1 %307  ;;  %v371_v41 = vld [vmem:[#allocation3 + $0x28] sm:$0xff] }
 0x1ac   : > { %310 = vst.msk [vmem:[#allocation3 + $0x18] sm:$0xf] %vm273_vm5, %v308_v40  ;;  %388 = vmatpush.msra.mxu1 %v371_v41 }
 0x1ad   : > { %v290_v42 = vpop.permute.xlu0 %289 }
 0x1ae   : > { %292 = vst.msk [vmem:[#allocation3 + $0xc] sm:$0xf] %vm273_vm5, %v290_v42  ;;  %389 = vmatpush.msra.mxu1 %v370_v43 }
 0x1b3   : > { %v302_v44 = vpop.permute.xlu1 %301  ;;  %v369_v45 = vld [vmem:[#allocation3 + $0x18] sm:$0xff] }
 0x1b4   : > { %304 = vst.msk [vmem:[#allocation3 + $0x14] sm:$0xf] %vm273_vm5, %v302_v44  ;;  %390 = vmatpush.msra.mxu1 %v369_v45 }
 0x1b5   : > { %v367_v48 = vld [vmem:[#allocation3 + $0x8] sm:$0xff] }
 0x1bb   : > { %v278_v46 = vpop.permute.xlu1 %277  ;;  %v368_v47 = vld [vmem:[#allocation3 + $0x10] sm:$0xff] }
 0x1bc   : > { %280 = vst.msk [vmem:[#allocation3 + $0x4] sm:$0xf] %vm273_vm5, %v278_v46  ;;  %391 = vmatpush.msra.mxu1 %v368_v47 }
 0x1be   : > { %392 = vmatpush.msra.mxu1 %v367_v48 }
 0x1c3   : > { %v366_v50 = vld [vmem:[#allocation3] sm:$0xff] }
 0x1c4   : > { %393 = vmatpush.msra.mxu1 %v366_v50 }
 0x1c5   : > { %526 = vmatmul.msk.f32.vlgmr.msra.gmra.mxu1 %vm374_vm6, %v365_v49 }
 0x242   : > { %v395_v55 = vpop.f32.mrf.mxu1 }
 0x243   : > { %v403_v56 = vmul.f32 %v400_v54, %v395_v55 }
 0x245   : > { %v406_v57 = vsel %vm402_vm8, %v403_v56, %v395_v55 }
 0x246   : > { %407 = vst.msk [vmem:[%s201_s26] sm:$0xf] %vm273_vm5, %v406_v57 }
 0x247   : > { %633 = shalt.err (!%p630_p5)
}
 0x248   : > { %532 = dma.vmem_to_hbm [thread:$0]  (%p765_p4), %s423_s27, 64, %s425_s28, %s409_s15  }
 0x249 PF: > { %p538_p6 = scmp.ge.s32.totalorder %s684_s17, 2  ;;  %s436_s9 = sand.u32 1, %s664_s12  }
 0x24a   : > { %s437_s10 = scalar_lea.sflag [#allocation5], %s436_s9 }
 0x24b   : > { %p535_p7 = pnand %p538_p6, %p772_p8 }
 0x24d   : > { %p536_p9 = pneg %p535_p7 }
 0x24f   : > { %659 = dma.done.wait (%p536_p9), %s437_s10, 64  }
 0x250   : > { %661 = vsyncadd (%p536_p9), %s437_s10, 4294967232  ;;  %s16_s17 = sadd.s32 1, %s684_s17   ;;  %s859_s12 = smov %s668_s13 }
 0x251   : > { %p13_p10 = scmp.ge.s32.totalorder %s16_s17, 4   ;;  %s860_s13 = smov %s672_s14 }
 0x252   : > { %s861_s14 = smov %s778_s25  ;;  %s862_s15 = smov %s680_s16 }
 0x253   : > { %s863_s16 = smov %s865_s20  ;;  %15 = sbr.rel (!%p13_p10) target bundleno = 4 (0x4), region = 71 }
 0x258   :  { %443 = vsyncpa [#allocation5], 1 }
 0x259   :  { %445 = vsyncpa [#allocation5 + $0x1], 1 }

</bundles_post_ra>
